<compile_context>
chip_gen: v6e
topology: v6e:2x2x1
jax: 0.10.0
libtpu: 0.0.40
codegen_flags: <defaults>
</compile_context>

<pallas_src>
import functools

import jax
import jax.numpy as jnp
from jax.experimental import pallas as pl
from jax.experimental.pallas import tpu as pltpu


def _round_up(x, m):
    return ((x + m - 1) // m) * m


def _pick_m_tile(mp):
    """Largest lane-tile in {512,384,256,128} that divides mp (mp % 128 == 0)."""
    for t in (512, 384, 256, 128):
        if mp % t == 0:
            return t
    return mp


def _largest_divisor_leq(n, cap):
    for d in range(min(n, cap), 0, -1):
        if n % d == 0:
            return d
    return n


def _spectral_mix_kernel(xr_ref, xi_ref, wr_ref, wi_ref, or_ref, oi_ref):
    """Complex channel mix for one (low/high, Cout-tile, M-tile) block.

    Shapes (leading stacked axis squeezed away by the BlockSpec):
      xr/xi: (B, Cin, TM)   wr/wi: (Cin, TCout, TM)   or/oi: (B, TCout, TM)
    out[b,o,m] = sum_i x[b,i,m] * w[i,o,m]   (complex, 4-mult form)
    """
    cin = xr_ref.shape[1]

    if cin <= 8:
        # Small Cin: load whole tiles once, static unroll; accumulators are
        # initialized from the i=0 products (no zero-fill pass).
        xr = xr_ref[...]
        xi = xi_ref[...]
        wr = wr_ref[...]
        wi = wi_ref[...]

        def prod(i):
            xr_i = xr[:, i, None, :]        # (B, 1, TM)
            xi_i = xi[:, i, None, :]
            wr_i = wr[None, i, :, :]        # (1, TCout, TM)
            wi_i = wi[None, i, :, :]
            return (xr_i * wr_i - xi_i * wi_i,
                    xr_i * wi_i + xi_i * wr_i)

        acc_r, acc_i = prod(0)
        for i in range(1, cin):
            p_r, p_i = prod(i)
            acc_r = acc_r + p_r
            acc_i = acc_i + p_i
    else:
        # Large Cin: bounded-unroll loop reading per-i slices from VMEM refs
        # so vreg live ranges stay small (no full-unroll spills).
        b, _, tm = xr_ref.shape
        tco = wr_ref.shape[1]

        def body(i, carry):
            acc_r, acc_i = carry
            xr_i = xr_ref[:, pl.ds(i, 1), :]      # (B, 1, TM)
            xi_i = xi_ref[:, pl.ds(i, 1), :]
            wr_i = wr_ref[pl.ds(i, 1), :, :]      # (1, TCout, TM)
            wi_i = wi_ref[pl.ds(i, 1), :, :]
            acc_r = acc_r + (xr_i * wr_i - xi_i * wi_i)
            acc_i = acc_i + (xr_i * wi_i + xi_i * wr_i)
            return acc_r, acc_i

        zero = jnp.zeros((b, tco, tm), jnp.float32)
        acc_r, acc_i = jax.lax.fori_loop(0, cin, body, (zero, zero), unroll=4)

    or_ref[...] = acc_r.astype(or_ref.dtype)
    oi_ref[...] = acc_i.astype(oi_ref.dtype)


def _spectral_channel_mix(x_modes, weights):
    """Fused complex contraction for the 2 stacked (low/high) mode blocks.

    x_modes: complex64 (2, B, Cin, m1, m2)
    weights: complex64 (2, Cin, Cout, m1, m2)
    returns: complex64 (2, B, Cout, m1, m2)
    """
    S, B, Cin, m1, m2 = x_modes.shape
    Cout = weights.shape[2]
    M = m1 * m2
    Mp = _round_up(M, 128)           # lane-dense: pad flattened modes to 128*k

    # Free reshapes (trailing dims contiguous); M stays on the lane axis.
    xr = jnp.real(x_modes).reshape(S, B, Cin, M)
    xi = jnp.imag(x_modes).reshape(S, B, Cin, M)
    wr = jnp.real(weights).reshape(S, Cin, Cout, M)
    wi = jnp.imag(weights).reshape(S, Cin, Cout, M)

    if Mp != M:
        pad = ((0, 0), (0, 0), (0, 0), (0, Mp - M))
        xr = jnp.pad(xr, pad)
        xi = jnp.pad(xi, pad)
        wr = jnp.pad(wr, pad)
        wi = jnp.pad(wi, pad)

    tm = _pick_m_tile(Mp)                       # 128..512-wide lane tiles
    tco = _largest_divisor_leq(Cout, 64)        # Cout tile (caps VMEM on v7x)
    n_co = Cout // tco
    n_m = Mp // tm
    grid = (S, n_co, n_m)

    # Leading stacked axis is squeezed (None) so the kernel sees 3-D tiles.
    x_spec = pl.BlockSpec((None, B, Cin, tm), lambda s, co, mt: (s, 0, 0, mt))
    w_spec = pl.BlockSpec((None, Cin, tco, tm), lambda s, co, mt: (s, 0, co, mt))
    o_spec = pl.BlockSpec((None, B, tco, tm), lambda s, co, mt: (s, 0, co, mt))

    # 4-mult complex form: 4 muls + 4 adds per MAC per output element.
    flops = S * 8 * B * Cin * Cout * Mp
    bytes_accessed = 4 * S * (n_co * 2 * B * Cin * Mp     # x re-read per Cout tile
                              + 2 * Cin * Cout * Mp       # weights read once
                              + 2 * B * Cout * Mp)        # outputs written once

    # Per-step double-buffered working set -> explicit scoped-VMEM limit
    # (v7x physical VMEM is 64 MiB; default scoped limit is 32 MiB).
    per_step_bytes = 4 * tm * (2 * B * Cin + 2 * Cin * tco + 2 * B * tco)
    vmem_limit = min(48 << 20, max(32 << 20, 3 * per_step_bytes + (4 << 20)))

    o_r, o_i = pl.pallas_call(
        _spectral_mix_kernel,
        out_shape=(
            jax.ShapeDtypeStruct((S, B, Cout, Mp), jnp.float32),
            jax.ShapeDtypeStruct((S, B, Cout, Mp), jnp.float32),
        ),
        grid_spec=pltpu.PrefetchScalarGridSpec(
            num_scalar_prefetch=0,
            grid=grid,
            in_specs=[x_spec, x_spec, w_spec, w_spec],
            out_specs=(o_spec, o_spec),
        ),
        compiler_params=pltpu.CompilerParams(
            dimension_semantics=("parallel", "parallel", "parallel"),
            vmem_limit_bytes=vmem_limit),
        cost_estimate=pl.CostEstimate(
            flops=flops, transcendentals=0, bytes_accessed=bytes_accessed),
    )(xr, xi, wr, wi)

    out = jax.lax.complex(o_r, o_i)                  # (S, B, Cout, Mp)
    out = out[..., :M]                               # strip lane padding
    return out.reshape(S, B, Cout, m1, m2)


def spectral_conv2d_fast(x, weights1, weights2, modes1, modes2):
    """Forward pass matching SpectralConv2d_fast.forward (x is NCHW float32)."""
    B, Cin, H, W = x.shape
    Cout = weights1.shape[1]
    Wf = W // 2 + 1
    assert 2 * modes1 <= H and modes2 <= Wf

    # TODO(synk): rfft2/irfft2 have no clean Pallas TPU equivalent; use jnp.fft.
    x_ft = jnp.fft.rfft2(x)                                  # (B, Cin, H, Wf)

    # Stack low/high frequency blocks so both contractions share one
    # pallas_call with a parallel grid axis.
    x_modes = jnp.stack(
        [x_ft[:, :, :modes1, :modes2], x_ft[:, :, H - modes1:, :modes2]],
        axis=0)                                              # (2, B, Cin, m1, m2)
    w = jnp.stack([weights1, weights2], axis=0)              # (2, Cin, Cout, m1, m2)

    out = _spectral_channel_mix(x_modes, w)                  # (2, B, Cout, m1, m2)

    # Assemble the spectrum with pad + concat (fusable by XLA) instead of a
    # zeros buffer followed by two scatter updates.
    pad_w = Wf - modes2
    lo = jnp.pad(out[0], ((0, 0), (0, 0), (0, 0), (0, pad_w)))
    hi = jnp.pad(out[1], ((0, 0), (0, 0), (0, 0), (0, pad_w)))
    mid = jnp.zeros((B, Cout, H - 2 * modes1, Wf), dtype=lo.dtype)
    out_ft = jnp.concatenate([lo, mid, hi], axis=2)          # (B, Cout, H, Wf)

    return jnp.fft.irfft2(out_ft, s=(H, W))                  # (B, Cout, H, W)


def _reference(x, weights1, weights2, modes1, modes2):
    B, Cin, H, W = x.shape
    Cout = weights1.shape[1]
    x_ft = jnp.fft.rfft2(x)
    out_ft = jnp.zeros((B, Cout, H, W // 2 + 1), dtype=jnp.complex64)
    lo = jnp.einsum('bixy,ioxy->boxy', x_ft[:, :, :modes1, :modes2], weights1)
    hi = jnp.einsum('bixy,ioxy->boxy', x_ft[:, :, -modes1:, :modes2], weights2)
    out_ft = out_ft.at[:, :, :modes1, :modes2].set(lo)
    out_ft = out_ft.at[:, :, H - modes1:, :modes2].set(hi)
    return jnp.fft.irfft2(out_ft, s=(H, W))


if __name__ == "__main__":
    # Small shapes consistent with the module: batch=2, channels=4, spatial=16.
    B, Cin, Cout, H, W = 2, 4, 4, 16, 16
    modes1, modes2 = 4, 4
    scale = 1.0 / (Cin * Cout)

    key = jax.random.PRNGKey(0)
    kx, kw1r, kw1i, kw2r, kw2i = jax.random.split(key, 5)

    x = jax.random.normal(kx, (B, Cin, H, W), dtype=jnp.float32)

    # torch.rand(..., dtype=cfloat) -> uniform [0,1) real and imag parts.
    weights1 = scale * (
        jax.random.uniform(kw1r, (Cin, Cout, modes1, modes2), dtype=jnp.float32)
        + 1j * jax.random.uniform(kw1i, (Cin, Cout, modes1, modes2), dtype=jnp.float32)
    ).astype(jnp.complex64)
    weights2 = scale * (
        jax.random.uniform(kw2r, (Cin, Cout, modes1, modes2), dtype=jnp.float32)
        + 1j * jax.random.uniform(kw2i, (Cin, Cout, modes1, modes2), dtype=jnp.float32)
    ).astype(jnp.complex64)

    fwd = jax.jit(functools.partial(spectral_conv2d_fast,
                                    modes1=modes1, modes2=modes2))
    out = jax.block_until_ready(fwd(x, weights1, weights2))

    ref = _reference(x, weights1, weights2, modes1, modes2)
    assert out.shape == (B, Cout, H, W)
    assert jnp.allclose(out, ref, atol=1e-4, rtol=1e-4), "mismatch vs reference"

    print("KERNEL_OK")
</pallas_src>

<mosaic_0001>
module attributes {stable_mosaic.version = 11 : i64} {
  func.func @_spectral_mix_kernel(%arg0: i32, %arg1: i32, %arg2: i32, %arg3: memref<1x2x4x128xf32, #tpu.memory_space<vmem>>, %arg4: memref<1x2x4x128xf32, #tpu.memory_space<vmem>>, %arg5: memref<1x4x4x128xf32, #tpu.memory_space<vmem>>, %arg6: memref<1x4x4x128xf32, #tpu.memory_space<vmem>>, %arg7: memref<1x2x4x128xf32, #tpu.memory_space<vmem>>, %arg8: memref<1x2x4x128xf32, #tpu.memory_space<vmem>>) attributes {dimension_semantics = [#tpu.dimension_semantics<parallel>, #tpu.dimension_semantics<parallel>, #tpu.dimension_semantics<parallel>], iteration_bounds = array<i64: 2, 1, 1>, scalar_prefetch = 0 : i64, scratch_operands = 0 : i64, tpu.core_type = #tpu.core_type<tc>, window_params = [{transform_indices = @transform_0, window_bounds = array<i64: 1, 2, 4, 128>}, {transform_indices = @transform_1, window_bounds = array<i64: 1, 2, 4, 128>}, {transform_indices = @transform_2, window_bounds = array<i64: 1, 4, 4, 128>}, {transform_indices = @transform_3, window_bounds = array<i64: 1, 4, 4, 128>}, {transform_indices = @transform_4, window_bounds = array<i64: 1, 2, 4, 128>}, {transform_indices = @transform_5, window_bounds = array<i64: 1, 2, 4, 128>}]} {
    %c0 = arith.constant 0 : index
    %c0_0 = arith.constant 0 : index
    %c0_1 = arith.constant 0 : index
    %c0_2 = arith.constant 0 : index
    %0 = vector.load %arg3[%c0, %c0_0, %c0_1, %c0_2] : memref<1x2x4x128xf32, #tpu.memory_space<vmem>>, vector<1x2x4x128xf32>
    %1 = vector.shape_cast %0 : vector<1x2x4x128xf32> to vector<2x4x128xf32>
    %c0_3 = arith.constant 0 : index
    %c0_4 = arith.constant 0 : index
    %c0_5 = arith.constant 0 : index
    %c0_6 = arith.constant 0 : index
    %2 = vector.load %arg4[%c0_3, %c0_4, %c0_5, %c0_6] : memref<1x2x4x128xf32, #tpu.memory_space<vmem>>, vector<1x2x4x128xf32>
    %3 = vector.shape_cast %2 : vector<1x2x4x128xf32> to vector<2x4x128xf32>
    %c0_7 = arith.constant 0 : index
    %c0_8 = arith.constant 0 : index
    %c0_9 = arith.constant 0 : index
    %c0_10 = arith.constant 0 : index
    %4 = vector.load %arg5[%c0_7, %c0_8, %c0_9, %c0_10] : memref<1x4x4x128xf32, #tpu.memory_space<vmem>>, vector<1x4x4x128xf32>
    %5 = vector.shape_cast %4 : vector<1x4x4x128xf32> to vector<4x4x128xf32>
    %c0_11 = arith.constant 0 : index
    %c0_12 = arith.constant 0 : index
    %c0_13 = arith.constant 0 : index
    %c0_14 = arith.constant 0 : index
    %6 = vector.load %arg6[%c0_11, %c0_12, %c0_13, %c0_14] : memref<1x4x4x128xf32, #tpu.memory_space<vmem>>, vector<1x4x4x128xf32>
    %7 = vector.shape_cast %6 : vector<1x4x4x128xf32> to vector<4x4x128xf32>
    %8 = vector.extract_strided_slice %1 {offsets = [0, 0, 0], sizes = [2, 1, 128], strides = [1, 1, 1]} : vector<2x4x128xf32> to vector<2x1x128xf32>
    %9 = vector.shape_cast %8 : vector<2x1x128xf32> to vector<2x128xf32>
    %10 = vector.shape_cast %9 : vector<2x128xf32> to vector<2x1x128xf32>
    %11 = vector.extract_strided_slice %3 {offsets = [0, 0, 0], sizes = [2, 1, 128], strides = [1, 1, 1]} : vector<2x4x128xf32> to vector<2x1x128xf32>
    %12 = vector.shape_cast %11 : vector<2x1x128xf32> to vector<2x128xf32>
    %13 = vector.shape_cast %12 : vector<2x128xf32> to vector<2x1x128xf32>
    %14 = vector.extract_strided_slice %5 {offsets = [0, 0, 0], sizes = [1, 4, 128], strides = [1, 1, 1]} : vector<4x4x128xf32> to vector<1x4x128xf32>
    %15 = vector.shape_cast %14 : vector<1x4x128xf32> to vector<4x128xf32>
    %16 = vector.shape_cast %15 : vector<4x128xf32> to vector<1x4x128xf32>
    %17 = vector.extract_strided_slice %7 {offsets = [0, 0, 0], sizes = [1, 4, 128], strides = [1, 1, 1]} : vector<4x4x128xf32> to vector<1x4x128xf32>
    %18 = vector.shape_cast %17 : vector<1x4x128xf32> to vector<4x128xf32>
    %19 = vector.shape_cast %18 : vector<4x128xf32> to vector<1x4x128xf32>
    %20 = vector.broadcast %10 : vector<2x1x128xf32> to vector<2x4x128xf32>
    %21 = vector.broadcast %16 : vector<1x4x128xf32> to vector<2x4x128xf32>
    %22 = arith.mulf %20, %21 : vector<2x4x128xf32>
    %23 = vector.broadcast %13 : vector<2x1x128xf32> to vector<2x4x128xf32>
    %24 = vector.broadcast %19 : vector<1x4x128xf32> to vector<2x4x128xf32>
    %25 = arith.mulf %23, %24 : vector<2x4x128xf32>
    %26 = arith.subf %22, %25 : vector<2x4x128xf32>
    %27 = vector.broadcast %10 : vector<2x1x128xf32> to vector<2x4x128xf32>
    %28 = vector.broadcast %19 : vector<1x4x128xf32> to vector<2x4x128xf32>
    %29 = arith.mulf %27, %28 : vector<2x4x128xf32>
    %30 = vector.broadcast %13 : vector<2x1x128xf32> to vector<2x4x128xf32>
    %31 = vector.broadcast %16 : vector<1x4x128xf32> to vector<2x4x128xf32>
    %32 = arith.mulf %30, %31 : vector<2x4x128xf32>
    %33 = arith.addf %29, %32 : vector<2x4x128xf32>
    %34 = vector.extract_strided_slice %1 {offsets = [0, 1, 0], sizes = [2, 1, 128], strides = [1, 1, 1]} : vector<2x4x128xf32> to vector<2x1x128xf32>
    %35 = vector.shape_cast %34 : vector<2x1x128xf32> to vector<2x128xf32>
    %36 = vector.shape_cast %35 : vector<2x128xf32> to vector<2x1x128xf32>
    %37 = vector.extract_strided_slice %3 {offsets = [0, 1, 0], sizes = [2, 1, 128], strides = [1, 1, 1]} : vector<2x4x128xf32> to vector<2x1x128xf32>
    %38 = vector.shape_cast %37 : vector<2x1x128xf32> to vector<2x128xf32>
    %39 = vector.shape_cast %38 : vector<2x128xf32> to vector<2x1x128xf32>
    %40 = vector.extract_strided_slice %5 {offsets = [1, 0, 0], sizes = [1, 4, 128], strides = [1, 1, 1]} : vector<4x4x128xf32> to vector<1x4x128xf32>
    %41 = vector.shape_cast %40 : vector<1x4x128xf32> to vector<4x128xf32>
    %42 = vector.shape_cast %41 : vector<4x128xf32> to vector<1x4x128xf32>
    %43 = vector.extract_strided_slice %7 {offsets = [1, 0, 0], sizes = [1, 4, 128], strides = [1, 1, 1]} : vector<4x4x128xf32> to vector<1x4x128xf32>
    %44 = vector.shape_cast %43 : vector<1x4x128xf32> to vector<4x128xf32>
    %45 = vector.shape_cast %44 : vector<4x128xf32> to vector<1x4x128xf32>
    %46 = vector.broadcast %36 : vector<2x1x128xf32> to vector<2x4x128xf32>
    %47 = vector.broadcast %42 : vector<1x4x128xf32> to vector<2x4x128xf32>
    %48 = arith.mulf %46, %47 : vector<2x4x128xf32>
    %49 = vector.broadcast %39 : vector<2x1x128xf32> to vector<2x4x128xf32>
    %50 = vector.broadcast %45 : vector<1x4x128xf32> to vector<2x4x128xf32>
    %51 = arith.mulf %49, %50 : vector<2x4x128xf32>
    %52 = arith.subf %48, %51 : vector<2x4x128xf32>
    %53 = vector.broadcast %36 : vector<2x1x128xf32> to vector<2x4x128xf32>
    %54 = vector.broadcast %45 : vector<1x4x128xf32> to vector<2x4x128xf32>
    %55 = arith.mulf %53, %54 : vector<2x4x128xf32>
    %56 = vector.broadcast %39 : vector<2x1x128xf32> to vector<2x4x128xf32>
    %57 = vector.broadcast %42 : vector<1x4x128xf32> to vector<2x4x128xf32>
    %58 = arith.mulf %56, %57 : vector<2x4x128xf32>
    %59 = arith.addf %55, %58 : vector<2x4x128xf32>
    %60 = arith.addf %26, %52 : vector<2x4x128xf32>
    %61 = arith.addf %33, %59 : vector<2x4x128xf32>
    %62 = vector.extract_strided_slice %1 {offsets = [0, 2, 0], sizes = [2, 1, 128], strides = [1, 1, 1]} : vector<2x4x128xf32> to vector<2x1x128xf32>
    %63 = vector.shape_cast %62 : vector<2x1x128xf32> to vector<2x128xf32>
    %64 = vector.shape_cast %63 : vector<2x128xf32> to vector<2x1x128xf32>
    %65 = vector.extract_strided_slice %3 {offsets = [0, 2, 0], sizes = [2, 1, 128], strides = [1, 1, 1]} : vector<2x4x128xf32> to vector<2x1x128xf32>
    %66 = vector.shape_cast %65 : vector<2x1x128xf32> to vector<2x128xf32>
    %67 = vector.shape_cast %66 : vector<2x128xf32> to vector<2x1x128xf32>
    %68 = vector.extract_strided_slice %5 {offsets = [2, 0, 0], sizes = [1, 4, 128], strides = [1, 1, 1]} : vector<4x4x128xf32> to vector<1x4x128xf32>
    %69 = vector.shape_cast %68 : vector<1x4x128xf32> to vector<4x128xf32>
    %70 = vector.shape_cast %69 : vector<4x128xf32> to vector<1x4x128xf32>
    %71 = vector.extract_strided_slice %7 {offsets = [2, 0, 0], sizes = [1, 4, 128], strides = [1, 1, 1]} : vector<4x4x128xf32> to vector<1x4x128xf32>
    %72 = vector.shape_cast %71 : vector<1x4x128xf32> to vector<4x128xf32>
    %73 = vector.shape_cast %72 : vector<4x128xf32> to vector<1x4x128xf32>
    %74 = vector.broadcast %64 : vector<2x1x128xf32> to vector<2x4x128xf32>
    %75 = vector.broadcast %70 : vector<1x4x128xf32> to vector<2x4x128xf32>
    %76 = arith.mulf %74, %75 : vector<2x4x128xf32>
    %77 = vector.broadcast %67 : vector<2x1x128xf32> to vector<2x4x128xf32>
    %78 = vector.broadcast %73 : vector<1x4x128xf32> to vector<2x4x128xf32>
    %79 = arith.mulf %77, %78 : vector<2x4x128xf32>
    %80 = arith.subf %76, %79 : vector<2x4x128xf32>
    %81 = vector.broadcast %64 : vector<2x1x128xf32> to vector<2x4x128xf32>
    %82 = vector.broadcast %73 : vector<1x4x128xf32> to vector<2x4x128xf32>
    %83 = arith.mulf %81, %82 : vector<2x4x128xf32>
    %84 = vector.broadcast %67 : vector<2x1x128xf32> to vector<2x4x128xf32>
    %85 = vector.broadcast %70 : vector<1x4x128xf32> to vector<2x4x128xf32>
    %86 = arith.mulf %84, %85 : vector<2x4x128xf32>
    %87 = arith.addf %83, %86 : vector<2x4x128xf32>
    %88 = arith.addf %60, %80 : vector<2x4x128xf32>
    %89 = arith.addf %61, %87 : vector<2x4x128xf32>
    %90 = vector.extract_strided_slice %1 {offsets = [0, 3, 0], sizes = [2, 1, 128], strides = [1, 1, 1]} : vector<2x4x128xf32> to vector<2x1x128xf32>
    %91 = vector.shape_cast %90 : vector<2x1x128xf32> to vector<2x128xf32>
    %92 = vector.shape_cast %91 : vector<2x128xf32> to vector<2x1x128xf32>
    %93 = vector.extract_strided_slice %3 {offsets = [0, 3, 0], sizes = [2, 1, 128], strides = [1, 1, 1]} : vector<2x4x128xf32> to vector<2x1x128xf32>
    %94 = vector.shape_cast %93 : vector<2x1x128xf32> to vector<2x128xf32>
    %95 = vector.shape_cast %94 : vector<2x128xf32> to vector<2x1x128xf32>
    %96 = vector.extract_strided_slice %5 {offsets = [3, 0, 0], sizes = [1, 4, 128], strides = [1, 1, 1]} : vector<4x4x128xf32> to vector<1x4x128xf32>
    %97 = vector.shape_cast %96 : vector<1x4x128xf32> to vector<4x128xf32>
    %98 = vector.shape_cast %97 : vector<4x128xf32> to vector<1x4x128xf32>
    %99 = vector.extract_strided_slice %7 {offsets = [3, 0, 0], sizes = [1, 4, 128], strides = [1, 1, 1]} : vector<4x4x128xf32> to vector<1x4x128xf32>
    %100 = vector.shape_cast %99 : vector<1x4x128xf32> to vector<4x128xf32>
    %101 = vector.shape_cast %100 : vector<4x128xf32> to vector<1x4x128xf32>
    %102 = vector.broadcast %92 : vector<2x1x128xf32> to vector<2x4x128xf32>
    %103 = vector.broadcast %98 : vector<1x4x128xf32> to vector<2x4x128xf32>
    %104 = arith.mulf %102, %103 : vector<2x4x128xf32>
    %105 = vector.broadcast %95 : vector<2x1x128xf32> to vector<2x4x128xf32>
    %106 = vector.broadcast %101 : vector<1x4x128xf32> to vector<2x4x128xf32>
    %107 = arith.mulf %105, %106 : vector<2x4x128xf32>
    %108 = arith.subf %104, %107 : vector<2x4x128xf32>
    %109 = vector.broadcast %92 : vector<2x1x128xf32> to vector<2x4x128xf32>
    %110 = vector.broadcast %101 : vector<1x4x128xf32> to vector<2x4x128xf32>
    %111 = arith.mulf %109, %110 : vector<2x4x128xf32>
    %112 = vector.broadcast %95 : vector<2x1x128xf32> to vector<2x4x128xf32>
    %113 = vector.broadcast %98 : vector<1x4x128xf32> to vector<2x4x128xf32>
    %114 = arith.mulf %112, %113 : vector<2x4x128xf32>
    %115 = arith.addf %111, %114 : vector<2x4x128xf32>
    %116 = arith.addf %88, %108 : vector<2x4x128xf32>
    %117 = arith.addf %89, %115 : vector<2x4x128xf32>
    %c0_15 = arith.constant 0 : index
    %c0_16 = arith.constant 0 : index
    %c0_17 = arith.constant 0 : index
    %c0_18 = arith.constant 0 : index
    %118 = vector.load %arg7[%c0_15, %c0_16, %c0_17, %c0_18] : memref<1x2x4x128xf32, #tpu.memory_space<vmem>>, vector<1x2x4x128xf32>
    %119 = vector.shape_cast %118 : vector<1x2x4x128xf32> to vector<2x4x128xf32>
    %120 = vector.shape_cast %116 : vector<2x4x128xf32> to vector<1x2x4x128xf32>
    tpu.vector_store %arg7[%c0_15, %c0_16, %c0_17, %c0_18], %120 {strides = array<i32>} : memref<1x2x4x128xf32, #tpu.memory_space<vmem>>, vector<1x2x4x128xf32>,
    %c0_19 = arith.constant 0 : index
    %c0_20 = arith.constant 0 : index
    %c0_21 = arith.constant 0 : index
    %c0_22 = arith.constant 0 : index
    %121 = vector.load %arg8[%c0_19, %c0_20, %c0_21, %c0_22] : memref<1x2x4x128xf32, #tpu.memory_space<vmem>>, vector<1x2x4x128xf32>
    %122 = vector.shape_cast %121 : vector<1x2x4x128xf32> to vector<2x4x128xf32>
    %123 = vector.shape_cast %117 : vector<2x4x128xf32> to vector<1x2x4x128xf32>
    tpu.vector_store %arg8[%c0_19, %c0_20, %c0_21, %c0_22], %123 {strides = array<i32>} : memref<1x2x4x128xf32, #tpu.memory_space<vmem>>, vector<1x2x4x128xf32>,
    return
  }
  func.func @transform_0(%arg0: i32, %arg1: i32, %arg2: i32) -> (i32, i32, i32, i32) {
    %c0_i32 = arith.constant 0 : i32
    %c0_i32_0 = arith.constant 0 : i32
    %c0_i32_1 = arith.constant 0 : i32
    return %arg0, %c0_i32, %c0_i32_0, %arg2 : i32, i32, i32, i32
  }
  func.func @transform_1(%arg0: i32, %arg1: i32, %arg2: i32) -> (i32, i32, i32, i32) {
    %c0_i32 = arith.constant 0 : i32
    %c0_i32_0 = arith.constant 0 : i32
    %c0_i32_1 = arith.constant 0 : i32
    return %arg0, %c0_i32, %c0_i32_0, %arg2 : i32, i32, i32, i32
  }
  func.func @transform_2(%arg0: i32, %arg1: i32, %arg2: i32) -> (i32, i32, i32, i32) {
    %c0_i32 = arith.constant 0 : i32
    %c0_i32_0 = arith.constant 0 : i32
    return %arg0, %c0_i32, %arg1, %arg2 : i32, i32, i32, i32
  }
  func.func @transform_3(%arg0: i32, %arg1: i32, %arg2: i32) -> (i32, i32, i32, i32) {
    %c0_i32 = arith.constant 0 : i32
    %c0_i32_0 = arith.constant 0 : i32
    return %arg0, %c0_i32, %arg1, %arg2 : i32, i32, i32, i32
  }
  func.func @transform_4(%arg0: i32, %arg1: i32, %arg2: i32) -> (i32, i32, i32, i32) {
    %c0_i32 = arith.constant 0 : i32
    %c0_i32_0 = arith.constant 0 : i32
    return %arg0, %c0_i32, %arg1, %arg2 : i32, i32, i32, i32
  }
  func.func @transform_5(%arg0: i32, %arg1: i32, %arg2: i32) -> (i32, i32, i32, i32) {
    %c0_i32 = arith.constant 0 : i32
    %c0_i32_0 = arith.constant 0 : i32
    return %arg0, %c0_i32, %arg1, %arg2 : i32, i32, i32, i32
  }
}

</mosaic_0001>

<bundles_post_ra>
// kernel: custom-call
= control target key start
LH: loop header
LB: loop body
LE: loop exit
PB: predicated region body
PF: predicated region fallthrough
CT: control target
= control target key end

     0   :  { %2 = vsyncpa [#allocation0], 0  ;;  %s47_s0 = inlined_call_operand.hbm [shape: c64[4,4,4,4], index: 0, kind: input, shape index: {}]   ;;  %s48_s1 = inlined_call_operand.vmem [shape: f32[4,4,4,4], index: 1, kind: output, shape index: {}]  }
   0x1   :  { %s3_s8 = sshll.u32 %s48_s1, 4  ;;  %s4_s8 = int_to_ptr.vmem [resolvable:$true] %s3_s8 }
   0x2   :  { %s17_s9 = scalar_lea.vmem %s4_s8, 1024  ;;  %p22_p1 = scmp.lt.s32.totalorder %s4_s8, %s4_s8 }
   0x3   :  { %p18_p0 = scmp.ne.s32.totalorder %s4_s8, %s17_s9  ;;  %p23_p2 = scmp.lt.s32.totalorder %s17_s9, %s17_s9 }
   0x5   :  { %p24_p3 = por %p23_p2, %p22_p1 }
   0x7   :  { %p25_p4 = pnand %p24_p3, %p18_p0 }
   0x9   :  { %28 = shalt.err (!%p25_p4)  }
   0xa   :  { %6 = dma.hbm_to_vmem [thread:$0]  %s47_s0, 1024, %s4_s8, [#allocation0] }
   0xb   :  { %29 = dma.done.wait [#allocation0], 1024  }
   0xc   :  { %30 = vsyncadd [#allocation0], 4294966272 }
   0xd   :  { %8 = vsyncpa [#allocation0], 1 }

// kernel: custom-call.1
= control target key start
LH: loop header
LB: loop body
LE: loop exit
PB: predicated region body
PF: predicated region fallthrough
CT: control target
= control target key end

     0   :  { %s51_s0 = inlined_call_operand.hbm [shape: c64[4,4,4,4], index: 0, kind: input, shape index: {}]   ;;  %s52_s1 = inlined_call_operand.vmem [shape: f32[4,4,4,4], index: 1, kind: output, shape index: {}]  }
   0x1   :  { %s2_s8 = scalar_lea.hbm %s51_s0, 1024 }
   0x2   :  { %3 = vsyncpa [#allocation0], 0  ;;  %s4_s11 = sshll.u32 %s52_s1, 4  ;;  %s5_s11 = int_to_ptr.vmem [resolvable:$true] %s4_s11 }
   0x3   :  { %s20_s12 = scalar_lea.vmem %s5_s11, 1024  ;;  %p25_p1 = scmp.lt.s32.totalorder %s5_s11, %s5_s11 }
   0x4   :  { %p21_p0 = scmp.ne.s32.totalorder %s5_s11, %s20_s12  ;;  %p26_p2 = scmp.lt.s32.totalorder %s20_s12, %s20_s12 }
   0x6   :  { %p27_p3 = por %p26_p2, %p25_p1 }
   0x8   :  { %p28_p4 = pnand %p27_p3, %p21_p0 }
   0xa   :  { %31 = shalt.err (!%p28_p4)  }
   0xb   :  { %7 = dma.hbm_to_vmem [thread:$0]  %s2_s8, 1024, %s5_s11, [#allocation0] }
   0xc   :  { %33 = dma.done.wait [#allocation0], 1024  }
   0xd   :  { %34 = vsyncadd [#allocation0], 4294966272 }
   0xe   :  { %9 = vsyncpa [#allocation0], 1 }

// kernel: squeeze.2
= control target key start
LH: loop header
LB: loop body
LE: loop exit
PB: predicated region body
PF: predicated region fallthrough
CT: control target
= control target key end

     0   :  { %vm12_vm0 = vcmask 31744   ;;  %s117_s10 = smov 116   ;;  %s118_s11 = smov 120   ;;  %s167_s0 = inlined_call_operand.vmem [shape: f32[1,2,4,16], index: 0, kind: input, shape index: {}]   ;;  %s168_s1 = inlined_call_operand.vmem [shape: f32[2,4,4,4], index: 1, kind: output, shape index: {}]  }
   0x1   :  { %v105_v0 = vld [vmem:[%s167_s0 + $0x4] sm:$0xf]  ;;  %v9_v1 = vld [vmem:[%s167_s0] sm:$0xf]  ;;  %s116_s0 = smov 124  }
   0x2   :  { %8 = vst [vmem:[#allocation1 + $0x8] sm:$0xf] %v105_v0  ;;  %10 = vst [vmem:[#allocation1] sm:$0xf] %v9_v1 }
   0x9   :  { %v11_v2 = vld [vmem:[#allocation1] sm:$0xf]   ;;  %v15_v4 = vld [vmem:[#allocation1 + $0x8] sm:$0xf]  }
   0xa   :  { %v19_v3 = vld.sshfl [vmem:[#allocation1] sm:$0xff pattern:$0xba983210]   ;;  %13 = vst.msk [vmem:[#allocation0] ss:$8 sm:$0xf] %vm12_vm0, %v11_v2  }
   0xb   :  { %20 = vrot.lane.b32.xlu0 %v19_v3, %s116_s0  ;;  %36 = vrot.lane.b32.xlu1 %v19_v3, %s117_s10  ;;  %18 = vst.msk [vmem:[#allocation0 + $0x20] ss:$8 sm:$0xf] %vm12_vm0, %v15_v4  }
   0xf   :  { %28 = vrot.lane.b32.xlu0 %v19_v3, %s118_s11 }
  0x7d   :  { %v21_v5 = vpop.permute.xlu0 %20   ;;  %v37_v6 = vpop.permute.xlu1 %36  }
  0x7e   :  { %24 = vst.msk [vmem:[#allocation0 + $0x1] ss:$8 sm:$0xf] %vm12_vm0, %v21_v5   ;;  %26 = vst.msk [vmem:[#allocation0 + $0x1] ss:$8 sm:$0xf0] %vm12_vm0, %v21_v5  }
  0x7f   :  { %40 = vst.msk [vmem:[#allocation0 + $0x3] ss:$8 sm:$0xf] %vm12_vm0, %v37_v6   ;;  %42 = vst.msk [vmem:[#allocation0 + $0x3] ss:$8 sm:$0xf0] %vm12_vm0, %v37_v6  }
  0x81   :  { %v29_v7 = vpop.permute.xlu0 %28  }
  0x82   :  { %32 = vst.msk [vmem:[#allocation0 + $0x2] ss:$8 sm:$0xf] %vm12_vm0, %v29_v7   ;;  %34 = vst.msk [vmem:[#allocation0 + $0x2] ss:$8 sm:$0xf0] %vm12_vm0, %v29_v7  }
  0x89   :  { %v47_v8 = vld [vmem:[#allocation0] sm:$0xf]  ;;  %v52_v9 = vld [vmem:[#allocation0 + $0x8] sm:$0xf]  ;;  %v58_v10 = vld [vmem:[#allocation0 + $0x10] sm:$0xf] }
  0x8a   :  { %50 = vst [vmem:[%s168_s1] sm:$0xf] %v47_v8  ;;  %106 = vst [vmem:[%s168_s1 + $0x4] sm:$0xf] %v52_v9  ;;  %v65_v11 = vld [vmem:[#allocation0 + $0x18] sm:$0xf] }
  0x8b   :  { %107 = vst [vmem:[%s168_s1 + $0x8] sm:$0xf] %v58_v10  ;;  %v72_v12 = vld [vmem:[#allocation0 + $0x20] sm:$0xf]  ;;  %v79_v13 = vld [vmem:[#allocation0 + $0x28] sm:$0xf] }
  0x8c   :  { %108 = vst [vmem:[%s168_s1 + $0xc] sm:$0xf] %v65_v11  ;;  %109 = vst [vmem:[%s168_s1 + $0x10] sm:$0xf] %v72_v12  ;;  %v86_v14 = vld [vmem:[#allocation0 + $0x30] sm:$0xf] }
  0x8d   :  { %110 = vst [vmem:[%s168_s1 + $0x14] sm:$0xf] %v79_v13  ;;  %v93_v15 = vld [vmem:[#allocation0 + $0x38] sm:$0xf]  ;;  %111 = vst [vmem:[%s168_s1 + $0x18] sm:$0xf] %v86_v14 }
  0x8e   :  { %112 = vst [vmem:[%s168_s1 + $0x1c] sm:$0xf] %v93_v15 }

// kernel: reverse.0
= control target key start
LH: loop header
LB: loop body
LE: loop exit
PB: predicated region body
PF: predicated region fallthrough
CT: control target
= control target key end

     0   :  { %v72_v3 = vlaneseq  ;;  %v65_v9 = vld [vmem:[#allocation0 + $0x7] ss:$-1 sm:$0xff]  ;;  %v79_v12 = vld [vmem:[#allocation0 + $0x17] ss:$-1 sm:$0xff]  ;;  %s331_s0 = inlined_call_operand.vmem [shape: f32[2,4,16,7], index: 0, kind: input, shape index: {}]   ;;  %s332_s1 = inlined_call_operand.vmem [shape: f32[2,4,16,7], index: 1, kind: output, shape index: {}]  }
   0x1   :  { %v45_v0 = vld [vmem:[%s331_s0] sm:$0xff]  ;;  %v47_v1 = vld [vmem:[%s331_s0 + $0x8] sm:$0xff]  ;;  %v49_v2 = vld [vmem:[%s331_s0 + $0x10] sm:$0xff]  ;;  %v66_v10 = vrot.slane %v65_v9, 1  ;;  %v80_v14 = vrot.slane %v79_v12, 1 }
   0x2   :  { %46 = vst [vmem:[#allocation0 + $0x8] sm:$0xff] %v45_v0  ;;  %48 = vst [vmem:[#allocation0 + $0x18] sm:$0xff] %v47_v1  ;;  %v51_v4 = vld [vmem:[%s331_s0 + $0x18] sm:$0xff]  ;;  %v53_v5 = vld [vmem:[%s331_s0 + $0x20] sm:$0xff]  ;;  %v73_v11 = vshrl.u32 %v72_v3, 7 }
   0x3   :  { %50 = vst [vmem:[#allocation0 + $0x28] sm:$0xff] %v49_v2  ;;  %v55_v6 = vld [vmem:[%s331_s0 + $0x28] sm:$0xff]  ;;  %52 = vst [vmem:[#allocation0 + $0x38] sm:$0xff] %v51_v4  ;;  %v57_v7 = vld [vmem:[%s331_s0 + $0x30] sm:$0xff] }
   0x4   :  { %54 = vst [vmem:[#allocation0 + $0x48] sm:$0xff] %v53_v5  ;;  %56 = vst [vmem:[#allocation0 + $0x58] sm:$0xff] %v55_v6  ;;  %v59_v8 = vld [vmem:[%s331_s0 + $0x38] sm:$0xff]  ;;  %v93_v13 = vld [vmem:[#allocation0 + $0x27] ss:$-1 sm:$0xff]  ;;  %vm74_vm0 = vcmp.lt.s32.totalorder %v73_v11, 7 }
   0x5   :  { %58 = vst [vmem:[#allocation0 + $0x68] sm:$0xff] %v57_v7  ;;  %60 = vst [vmem:[#allocation0 + $0x78] sm:$0xff] %v59_v8  ;;  %v94_v15 = vrot.slane %v93_v13, 1  ;;  %v107_v16 = vld [vmem:[#allocation0 + $0x37] ss:$-1 sm:$0xff] }
   0x6   :  { %67 = vst [vmem:[#allocation1] sm:$0xff] %v66_v10  ;;  %v108_v17 = vrot.slane %v107_v16, 1  ;;  %v121_v18 = vld [vmem:[#allocation0 + $0x47] ss:$-1 sm:$0xff]  ;;  %v135_v19 = vld [vmem:[#allocation0 + $0x57] ss:$-1 sm:$0xff] }
   0x7   :  { %81 = vst [vmem:[#allocation1 + $0x8] sm:$0xff] %v80_v14  ;;  %95 = vst [vmem:[#allocation1 + $0x10] sm:$0xff] %v94_v15  ;;  %v122_v20 = vrot.slane %v121_v18, 1  ;;  %v136_v21 = vrot.slane %v135_v19, 1  ;;  %v149_v22 = vld [vmem:[#allocation0 + $0x67] ss:$-1 sm:$0xff] }
   0x8   :  { %v163_v23 = vld [vmem:[#allocation0 + $0x77] ss:$-1 sm:$0xff]  ;;  %109 = vst [vmem:[#allocation1 + $0x18] sm:$0xff] %v108_v17  ;;  %v150_v24 = vrot.slane %v149_v22, 1 }
   0x9   :  { %v164_v25 = vrot.slane %v163_v23, 1  ;;  %v70_v26 = vld [vmem:[#allocation0 + $0xf] ss:$-1 sm:$0xff]  ;;  %v84_v27 = vld [vmem:[#allocation0 + $0x1f] ss:$-1 sm:$0xff]  ;;  %123 = vst [vmem:[#allocation1 + $0x20] sm:$0xff] %v122_v20 }
   0xa   :  { %v98_v28 = vld [vmem:[#allocation0 + $0x2f] ss:$-1 sm:$0xff]  ;;  %137 = vst [vmem:[#allocation1 + $0x28] sm:$0xff] %v136_v21  ;;  %v71_v29 = vrot.slane %v70_v26, 1  ;;  %v85_v30 = vrot.slane %v84_v27, 1  ;;  %151 = vst [vmem:[#allocation1 + $0x30] sm:$0xff] %v150_v24 }
   0xb   :  { %v99_v31 = vrot.slane %v98_v28, 1  ;;  %v112_v32 = vld [vmem:[#allocation0 + $0x3f] ss:$-1 sm:$0xff]  ;;  %165 = vst [vmem:[#allocation1 + $0x38] sm:$0xff] %v164_v25  ;;  %v126_v34 = vld [vmem:[#allocation0 + $0x4f] ss:$-1 sm:$0xff] }
   0xc   :  { %v113_v33 = vrot.slane %v112_v32, 1  ;;  %v140_v35 = vld [vmem:[#allocation0 + $0x5f] ss:$-1 sm:$0xff]  ;;  %75 = vst.msk [vmem:[#allocation1] sm:$0xff] %vm74_vm0, %v71_v29  ;;  %89 = vst.msk [vmem:[#allocation1 + $0x8] sm:$0xff] %vm74_vm0, %v85_v30  ;;  %v127_v36 = vrot.slane %v126_v34, 1 }
   0xd   :  { %103 = vst.msk [vmem:[#allocation1 + $0x10] sm:$0xff] %vm74_vm0, %v99_v31  ;;  %v141_v37 = vrot.slane %v140_v35, 1  ;;  %v154_v38 = vld [vmem:[#allocation0 + $0x6f] ss:$-1 sm:$0xff]  ;;  %v168_v39 = vld [vmem:[#allocation0 + $0x7f] ss:$-1 sm:$0xff] }
   0xe   :  { %117 = vst.msk [vmem:[#allocation1 + $0x18] sm:$0xff] %vm74_vm0, %v113_v33  ;;  %v155_v40 = vrot.slane %v154_v38, 1  ;;  %v169_v41 = vrot.slane %v168_v39, 1  ;;  %131 = vst.msk [vmem:[#allocation1 + $0x20] sm:$0xff] %vm74_vm0, %v127_v36 }
   0xf   :  { %145 = vst.msk [vmem:[#allocation1 + $0x28] sm:$0xff] %vm74_vm0, %v141_v37 }
  0x10   :  { %159 = vst.msk [vmem:[#allocation1 + $0x30] sm:$0xff] %vm74_vm0, %v155_v40  ;;  %173 = vst.msk [vmem:[#allocation1 + $0x38] sm:$0xff] %vm74_vm0, %v169_v41 }
  0x13   :  { %v216_v42 = vld [vmem:[#allocation1] sm:$0xff]  ;;  %v218_v43 = vld [vmem:[#allocation1 + $0x8] sm:$0xff] }
  0x14   :  { %v220_v44 = vld [vmem:[#allocation1 + $0x10] sm:$0xff]  ;;  %217 = vst [vmem:[%s332_s1] sm:$0xff] %v216_v42  ;;  %219 = vst [vmem:[%s332_s1 + $0x8] sm:$0xff] %v218_v43 }
  0x15   :  { %221 = vst [vmem:[%s332_s1 + $0x10] sm:$0xff] %v220_v44  ;;  %v222_v45 = vld [vmem:[#allocation1 + $0x18] sm:$0xff]  ;;  %v224_v46 = vld [vmem:[#allocation1 + $0x20] sm:$0xff] }
  0x16   :  { %223 = vst [vmem:[%s332_s1 + $0x18] sm:$0xff] %v222_v45  ;;  %v226_v47 = vld [vmem:[#allocation1 + $0x28] sm:$0xff]  ;;  %225 = vst [vmem:[%s332_s1 + $0x20] sm:$0xff] %v224_v46 }
  0x17   :  { %227 = vst [vmem:[%s332_s1 + $0x28] sm:$0xff] %v226_v47  ;;  %v228_v48 = vld [vmem:[#allocation1 + $0x30] sm:$0xff]  ;;  %v230_v49 = vld [vmem:[#allocation1 + $0x38] sm:$0xff] }
  0x18   :  { %229 = vst [vmem:[%s332_s1 + $0x30] sm:$0xff] %v228_v48  ;;  %231 = vst [vmem:[%s332_s1 + $0x38] sm:$0xff] %v230_v49 }

// kernel: spectral_conv2d_fast.1
= control target key start
LH: loop header
LB: loop body
LE: loop exit
PB: predicated region body
PF: predicated region fallthrough
CT: control target
= control target key end

     0   :  { %s871_s18 = smov 0   ;;  %s873_s19 = smov 0   ;;  %s946_s0 = inlined_call_operand.vmem [shape: f32[2,2,4,128], index: 0, kind: input, shape index: {}]   ;;  %s947_s1 = inlined_call_operand.vmem [shape: f32[2,2,4,128], index: 1, kind: input, shape index: {}]   ;;  %s948_s2 = inlined_call_operand.vmem [shape: f32[2,4,4,128], index: 2, kind: input, shape index: {}]   ;;  %s949_s3 = inlined_call_operand.vmem [shape: f32[2,4,4,128], index: 3, kind: input, shape index: {}]   ;;  %s950_s4 = inlined_call_operand.vmem [shape: f32[2,2,4,128], index: 4, kind: output, shape index: {0}]   ;;  %s951_s5 = inlined_call_operand.vmem [shape: f32[2,2,4,128], index: 5, kind: output, shape index: {1}]  }
   0x1   :  { %s875_s20 = smov 0  }
   0x2 LB: > { %s35_s21 = sadd.s32 1, %s835_s19  ;;  %p772_p0 = scmp.ge.s32.totalorder %s839_s20, 1  ;;  %s839_s20 = sphi %s875_s20, %s16_s20   ;;  %s835_s19 = sphi %s873_s19, %s953_s19   ;;  %s831_s18 = sphi %s871_s18, %s952_s18  }
   0x3   : > { %p37_p1 = scmp.ge.s32.totalorder %s35_s21, 2  ;;  %p277_p2 = scmp.lt.s32.totalorder %s839_s20, 3 }
   0x5   : > { %s955_s21 = smov (%p37_p1, %s35_s21), 0  ;;  %p278_p3 = pnand %p772_p0, %p277_p2 }
   0x6   : > { %p355_p4 = scmp.lt.s32.totalorder (!%p278_p3), %s831_s18, 1 }
   0x7   : > { %281 = sbr.rel (%p278_p3) target bundleno = 43 (0x2b), region = 36 }
   0xc   : > { %v427_v0 = vlaneseq  ;;  %s957_s18 = smov (!%p355_p4, %s831_s18), 1 }
   0xd   : > { %s889_s22 = sshll.u32 %s957_s18, 3  ;;  %s789_s23 = sshll.u32 %s957_s18, 4 }
   0xe   : > { %v428_v1 = vshrl.u32 %v427_v0, 7  ;;  %s362_s26 = scalar_lea.vmem %s946_s0, %s889_s22  ;;  %s370_s29 = scalar_lea.vmem %s947_s1, %s889_s22 }
   0xf   : > { %s381_s7 = scalar_lea.vmem %s948_s2, %s789_s23  ;;  %s392_s10 = scalar_lea.vmem %s949_s3, %s789_s23  ;;  %v415_v6 = vld [vmem:[%s362_s26] sm:$0xf]  ;;  %v416_v7 = vld [vmem:[%s362_s26 + $0x4] sm:$0xf] }
  0x10   : > { %v429_v2 = vsub.s32 0, %v428_v1  ;;  %v457_v3 = vsub.s32 1, %v428_v1  ;;  %v489_v4 = vsub.s32 2, %v428_v1  ;;  %v521_v5 = vsub.s32 3, %v428_v1  ;;  %v417_v8 = vld [vmem:[%s370_s29] sm:$0xf]  ;;  %s403_s13 = scalar_lea.vmem %s950_s4, %s889_s22  ;;  %s414_s16 = scalar_lea.vmem %s951_s5, %s889_s22 }
  0x11   : > { %v418_v9 = vld [vmem:[%s370_s29 + $0x4] sm:$0xf]  ;;  %v905_v10 = vld [vmem:[%s381_s7] sm:$0xf]  ;;  %v909_v16 = vld [vmem:[%s381_s7 + $0x8] sm:$0xf] }
  0x12   : > { %v907_v11 = vld [vmem:[%s381_s7 + $0x4] sm:$0xf]  ;;  %v430_v12 = vrot.slane %v415_v6, %v429_v2  ;;  %v440_v13 = vrot.slane %v417_v8, %v429_v2  ;;  %v458_v14 = vrot.slane %v415_v6, %v457_v3  ;;  %v468_v15 = vrot.slane %v417_v8, %v457_v3  ;;  %v911_v17 = vld [vmem:[%s381_s7 + $0xc] sm:$0xf]  ;;  %v423_v18 = vld [vmem:[%s392_s10] sm:$0xf] }
  0x13   : > { %v490_v19 = vrot.slane %v415_v6, %v489_v4  ;;  %v500_v20 = vrot.slane %v417_v8, %v489_v4  ;;  %v522_v21 = vrot.slane %v415_v6, %v521_v5  ;;  %v532_v22 = vrot.slane %v417_v8, %v521_v5  ;;  %v424_v23 = vld [vmem:[%s392_s10 + $0x4] sm:$0xf]  ;;  %v425_v24 = vld [vmem:[%s392_s10 + $0x8] sm:$0xf]  ;;  %v426_v25 = vld [vmem:[%s392_s10 + $0xc] sm:$0xf] }
  0x14   : > { %v435_v26 = vmul.f32 %v430_v12, %v905_v10  ;;  %v445_v27 = vmul.f32 %v440_v13, %v423_v18  ;;  %v463_v28 = vmul.f32 %v458_v14, %v907_v11  ;;  %v434_v29 = vrot.slane %v416_v7, %v429_v2 }
  0x15   : > { %v473_v30 = vmul.f32 %v468_v15, %v424_v23  ;;  %v495_v31 = vmul.f32 %v490_v19, %v909_v16  ;;  %v505_v32 = vmul.f32 %v500_v20, %v425_v24  ;;  %v527_v33 = vmul.f32 %v522_v21, %v911_v17 }
  0x16   : > { %v447_v34 = vsub.f32 %v435_v26, %v445_v27  ;;  %v537_v35 = vmul.f32 %v532_v22, %v426_v25  ;;  %v436_v36 = vmul.f32 %v434_v29, %v905_v10  ;;  %v444_v37 = vrot.slane %v418_v9, %v429_v2 }
  0x17   : > { %v475_v38 = vsub.f32 %v463_v28, %v473_v30  ;;  %v507_v39 = vsub.f32 %v495_v31, %v505_v32  ;;  %v462_v40 = vrot.slane %v416_v7, %v457_v3  ;;  %v472_v41 = vrot.slane %v418_v9, %v457_v3 }
  0x18   : > { %v539_v42 = vsub.f32 %v527_v33, %v537_v35  ;;  %v446_v43 = vmul.f32 %v444_v37, %v423_v18  ;;  %v494_v44 = vrot.slane %v416_v7, %v489_v4  ;;  %v504_v45 = vrot.slane %v418_v9, %v489_v4 }
  0x19   : > { %v483_v46 = vadd.f32 %v475_v38, %v447_v34  ;;  %v464_v47 = vmul.f32 %v462_v40, %v907_v11  ;;  %v474_v48 = vmul.f32 %v472_v41, %v424_v23  ;;  %v526_v49 = vrot.slane %v416_v7, %v521_v5 }
  0x1a   : > { %v448_v50 = vsub.f32 %v436_v36, %v446_v43  ;;  %v496_v51 = vmul.f32 %v494_v44, %v909_v16  ;;  %v506_v52 = vmul.f32 %v504_v45, %v425_v24  ;;  %v536_v53 = vrot.slane %v418_v9, %v521_v5 }
  0x1b   : > { %v515_v54 = vadd.f32 %v507_v39, %v483_v46  ;;  %v476_v55 = vsub.f32 %v464_v47, %v474_v48  ;;  %v528_v56 = vmul.f32 %v526_v49, %v911_v17  ;;  %v449_v57 = vmul.f32 %v430_v12, %v423_v18 }
  0x1c   : > { %v508_v58 = vsub.f32 %v496_v51, %v506_v52  ;;  %v538_v59 = vmul.f32 %v536_v53, %v426_v25  ;;  %v451_v60 = vmul.f32 %v440_v13, %v905_v10  ;;  %v477_v61 = vmul.f32 %v458_v14, %v424_v23 }
  0x1d   : > { %v547_v62 = vadd.f32 %v539_v42, %v515_v54  ;;  %v484_v63 = vadd.f32 %v476_v55, %v448_v50  ;;  %v479_v0 = vmul.f32 %v468_v15, %v907_v11  ;;  %v509_v1 = vmul.f32 %v490_v19, %v425_v24 }
  0x1e   : > { %v540_v2 = vsub.f32 %v528_v56, %v538_v59  ;;  %v453_v3 = vadd.f32 %v451_v60, %v449_v57  ;;  %v511_v4 = vmul.f32 %v500_v20, %v909_v16  ;;  %v541_v5 = vmul.f32 %v522_v21, %v426_v25 }
  0x1f   : > { %551 = vst [vmem:[%s403_s13] sm:$0xf] %v547_v62  ;;  %v516_v6 = vadd.f32 %v508_v58, %v484_v63  ;;  %v481_v7 = vadd.f32 %v479_v0, %v477_v61  ;;  %v543_v8 = vmul.f32 %v532_v22, %v911_v17  ;;  %v450_v9 = vmul.f32 %v434_v29, %v423_v18 }
  0x20   : > { %v513_v12 = vadd.f32 %v511_v4, %v509_v1  ;;  %v452_v13 = vmul.f32 %v444_v37, %v905_v10  ;;  %v478_v14 = vmul.f32 %v462_v40, %v424_v23  ;;  %v480_v26 = vmul.f32 %v472_v41, %v907_v11 }
  0x21   : > { %v548_v15 = vadd.f32 %v540_v2, %v516_v6  ;;  %v485_v19 = vadd.f32 %v481_v7, %v453_v3  ;;  %v545_v27 = vadd.f32 %v543_v8, %v541_v5  ;;  %v510_v28 = vmul.f32 %v494_v44, %v425_v24 }
  0x22   : > { %v454_v30 = vadd.f32 %v452_v13, %v450_v9  ;;  %v482_v20 = vadd.f32 %v480_v26, %v478_v14  ;;  %v512_v21 = vmul.f32 %v504_v45, %v909_v16  ;;  %v542_v31 = vmul.f32 %v526_v49, %v426_v25 }
  0x23   : > { %552 = vst [vmem:[%s403_s13 + $0x4] sm:$0xf] %v548_v15  ;;  %v517_v32 = vadd.f32 %v513_v12, %v485_v19  ;;  %v544_v18 = vmul.f32 %v536_v53, %v911_v17 }
  0x24   : > { %v486_v10 = vadd.f32 %v482_v20, %v454_v30  ;;  %v514_v22 = vadd.f32 %v512_v21, %v510_v28 }
  0x25   : > { %v549_v11 = vadd.f32 %v545_v27, %v517_v32  ;;  %v546_v23 = vadd.f32 %v544_v18, %v542_v31 }
  0x26   : > { %v518_v29 = vadd.f32 %v514_v22, %v486_v10 }
  0x27   : > { %553 = vst [vmem:[%s414_s16] sm:$0xf] %v549_v11 }
  0x28   : > { %v550_v24 = vadd.f32 %v546_v23, %v518_v29 }
  0x2a   : > { %554 = vst [vmem:[%s414_s16 + $0x4] sm:$0xf] %v550_v24 }
  0x2b PF: > { %s16_s20 = sadd.s32 1, %s839_s20   ;;  %s952_s18 = smov %s835_s19 }
  0x2c   : > { %p13_p5 = scmp.ge.s32.totalorder %s16_s20, 4   ;;  %s953_s19 = smov %s955_s21 }
  0x2e   :  { %15 = sbr.rel (!%p13_p5) target bundleno = 2 (0x2), region = 87 }

</bundles_post_ra>
